<compile_context>
chip_gen: v7x
topology: tpu7x:2x2x1
jax: 0.10.0
libtpu: 0.0.40
codegen_flags: <defaults>
</compile_context>

<pallas_src>
import jax
import jax.numpy as jnp
from jax import lax
from jax.experimental import pallas as pl
from jax.experimental.pallas import tpu as pltpu

_SUBLANES = 8               # f32 vreg sublane count
_LANE = 128                 # vreg lane count
_DEFAULT_LANES = 1024       # row width (multiple of 128) -> contiguous rows
_DEFAULT_BLOCK_ROWS = 512   # 512 x 1024 x 4 B = 2 MiB per grid step


def _round_up(a, b):
    return -(-a // b) * b


def _exp_kernel(x_ref, o_ref):
    # Input is logtau + log(tau_mean), pre-shifted/padded at __init__, so the
    # only heavy vector op is the EUP exp push.  astype is a no-op for f32
    # inputs and a cheap load-side upcast for bf16 inputs.
    o_ref[...] = jnp.exp(x_ref[...].astype(jnp.float32))


def compute_tau_padded(logtau_shifted_padded, block_rows):
    """exp() over the pre-padded (rows, lanes) parameter, row-tiled blocks."""
    rows, lanes = logtau_shifted_padded.shape
    assert block_rows % _SUBLANES == 0 and rows % block_rows == 0
    grid_len = rows // block_rows
    return pl.pallas_call(
        _exp_kernel,
        out_shape=jax.ShapeDtypeStruct((rows, lanes), jnp.float32),
        grid=(grid_len,),
        in_specs=[pl.BlockSpec((block_rows, lanes), lambda i: (i, 0))],
        out_specs=pl.BlockSpec((block_rows, lanes), lambda i: (i, 0)),
        compiler_params=pltpu.CompilerParams(
            dimension_semantics=("parallel",)),   # megacore split on v7x
    )(logtau_shifted_padded)


class WQuESTModelJAX:
    """JAX/Pallas port of wQuEST_model (the defined portion of forward)."""

    def __init__(self, tau_init, wt=None, d=None, wd=None, c=0.1, mu=0.1,
                 weights="test", w_args=None, omega=100, method="root",
                 verbose=True, *, lanes=_DEFAULT_LANES,
                 block_rows=_DEFAULT_BLOCK_ROWS, param_dtype=jnp.float32,
                 force_pallas=False):
        tau_init = jnp.asarray(tau_init, dtype=jnp.float32)
        self.p = int(tau_init.shape[0])
        self.tau_mean = jnp.mean(tau_init, axis=0)            # scalar
        self.logtau = jnp.log(tau_init / self.tau_mean)       # (p,) "parameter"
        self.log_tau_mean = jnp.log(self.tau_mean)            # scalar
        self.wt = None if wt is None else jnp.asarray(wt, dtype=jnp.float32)
        self.d = jnp.ones((1,), jnp.float32) if d is None else jnp.asarray(d, jnp.float32)
        self.wd = jnp.ones((1,), jnp.float32) if wd is None else jnp.asarray(wd, jnp.float32)
        self.c = c
        self.mu = mu
        self.weights = weights
        self.w_args = w_args
        self.omega = omega
        self.method = method
        self.verbose = verbose

        # ---- Kernel layout, built ONCE (pad/reshape/shift hoisted out of the
        # per-call path). ----
        lanes = max(_LANE, (int(lanes) // _LANE) * _LANE)
        block_rows = max(_SUBLANES, (int(block_rows) // _SUBLANES) * _SUBLANES)
        rows_needed = -(-self.p // lanes)
        self.lanes = lanes
        self.block_rows = min(block_rows, _round_up(rows_needed, _SUBLANES))
        self.rows = _round_up(rows_needed, self.block_rows)
        p_pad = self.rows * self.lanes

        # Pallas only pays off with >= 2 grid steps; otherwise a plain-JAX
        # fast path (single fused XLA op) is cheaper.  force_pallas overrides.
        self.use_pallas = bool(force_pallas) or self.rows > self.block_rows

        if self.use_pallas:
            # logtau + log(tau_mean) folded into the exponent; +inf padding so
            # padded entries exp() to +inf and sort to the end.
            shifted = (self.logtau + self.log_tau_mean).astype(jnp.float32)
            padded = jnp.pad(shifted, (0, p_pad - self.p),
                             constant_values=jnp.inf)
            self._logtau_padded = padded.reshape(self.rows, self.lanes).astype(param_dtype)
            if self.wt is not None:
                # f32 sort key (same ordering/ties as argsort(logtau)).
                self._sort_key = padded
                self._wt_padded = jnp.pad(self.wt, (0, p_pad - self.p))

    # -- unsorted spectrum -------------------------------------------------
    def get_tau(self):
        if self.use_pallas:
            tau_pad = compute_tau_padded(self._logtau_padded, self.block_rows)
            return tau_pad.reshape(-1)[: self.p]
        return jnp.exp(self.logtau + self.log_tau_mean)

    # -- forward -----------------------------------------------------------
    def forward(self):
        if self.use_pallas:
            # Pallas streaming exp over the pre-padded parameter; padded lanes
            # are +inf, so the padded output feeds the sort directly and [:p]
            # is sliced once after the sort.
            tau_pad = compute_tau_padded(self._logtau_padded,
                                         self.block_rows).reshape(-1)
            if self.wt is None:
                tau_sorted = jnp.sort(tau_pad)[: self.p]
                wt_sorted = None
            else:
                # Key = (shifted) logtau so ties pair wt exactly like
                # wt[argsort(logtau)], even if f32 exp collapses them.
                _, tau_s, wt_s = lax.sort(
                    (self._sort_key, tau_pad, self._wt_padded),
                    num_keys=1, is_stable=True)
                tau_sorted = tau_s[: self.p]
                wt_sorted = wt_s[: self.p]
        else:
            # Small-p fast path: XLA fuses this into one op.
            tau = jnp.exp(self.logtau + self.log_tau_mean)
            if self.wt is None:
                tau_sorted = jnp.sort(tau)
                wt_sorted = None
            else:
                _, tau_sorted, wt_sorted = lax.sort(
                    (self.logtau, tau, self.wt), num_keys=1, is_stable=True)

        # TODO(synk): `f_xi.apply` (weighted QuEST spectral-estimator
        # fixed-point solver) is not defined in the reference module and has
        # no Pallas equivalent; return the sorted population spectrum (its
        # primary input).  `wt_sorted` would be passed alongside it.
        del wt_sorted
        return tau_sorted


if __name__ == "__main__":
    key = jax.random.PRNGKey(0)
    k1, k2, k3, k4 = jax.random.split(key, 4)

    # --- Path A: small p -> plain-JAX fast path (Pallas deliberately skipped).
    p_small = 200
    tau_small = jax.random.uniform(k1, (p_small,), minval=0.5, maxval=2.0,
                                   dtype=jnp.float32)
    wt_small = jax.random.uniform(k2, (p_small,), dtype=jnp.float32)
    m_small = WQuESTModelJAX(tau_small, wt=wt_small)
    out_small = jax.block_until_ready(m_small.forward())
    ref_idx = jnp.argsort(m_small.logtau)
    ref_small = jnp.exp(jnp.take(m_small.logtau, ref_idx)) * m_small.tau_mean
    assert out_small.shape == (p_small,)
    assert jnp.allclose(out_small, ref_small, rtol=1e-4, atol=1e-6)

    # --- Path B: Pallas kernel path forced at a small shape (multi-step grid:
    # p=5000, lanes=128, block_rows=8 -> rows=40, grid=5; padded tail = +inf).
    p = 5000
    tau_init = jax.random.uniform(k3, (p,), minval=0.5, maxval=2.0,
                                  dtype=jnp.float32)
    wt = jax.random.uniform(k4, (p,), dtype=jnp.float32)

    model = WQuESTModelJAX(tau_init, lanes=128, block_rows=8,
                           force_pallas=True)
    assert model.use_pallas and model.rows // model.block_rows == 5
    out = jax.block_until_ready(model.forward())
    ref_idx = jnp.argsort(model.logtau)
    ref = jnp.exp(jnp.take(model.logtau, ref_idx)) * model.tau_mean
    assert out.shape == (p,)
    assert bool(jnp.all(jnp.isfinite(out)))
    assert jnp.allclose(out, ref, rtol=1e-4, atol=1e-6)

    # wt provided: tie-exact multi-operand sort keyed on logtau.
    model_w = WQuESTModelJAX(tau_init, wt=wt, lanes=128, block_rows=8,
                             force_pallas=True)
    out_w = jax.block_until_ready(model_w.forward())
    assert jnp.allclose(out_w, ref, rtol=1e-4, atol=1e-6)

    # get_tau (unsorted spectrum) via the same Pallas kernel.
    tau_unsorted = jax.block_until_ready(model.get_tau())
    assert jnp.allclose(tau_unsorted,
                        jnp.exp(model.logtau) * model.tau_mean,
                        rtol=1e-4, atol=1e-6)

    print("KERNEL_OK")
</pallas_src>

<mosaic_0001>
module attributes {stable_mosaic.version = 11 : i64} {
  func.func @_exp_kernel(%arg0: i32, %arg1: memref<8x128xf32, #tpu.memory_space<vmem>>, %arg2: memref<8x128xf32, #tpu.memory_space<vmem>>) attributes {dimension_semantics = [#tpu.dimension_semantics<parallel>], iteration_bounds = array<i64: 5>, scalar_prefetch = 0 : i64, scratch_operands = 0 : i64, tpu.core_type = #tpu.core_type<tc>, window_params = [{transform_indices = @transform_0, window_bounds = array<i64: 8, 128>}, {transform_indices = @transform_1, window_bounds = array<i64: 8, 128>}]} {
    %c0 = arith.constant 0 : index
    %c0_0 = arith.constant 0 : index
    %0 = vector.load %arg1[%c0, %c0_0] : memref<8x128xf32, #tpu.memory_space<vmem>>, vector<8x128xf32>
    %1 = math.exp %0 : vector<8x128xf32>
    %c0_1 = arith.constant 0 : index
    %c0_2 = arith.constant 0 : index
    %2 = vector.load %arg2[%c0_1, %c0_2] : memref<8x128xf32, #tpu.memory_space<vmem>>, vector<8x128xf32>
    tpu.vector_store %arg2[%c0_1, %c0_2], %1 {strides = array<i32>} : memref<8x128xf32, #tpu.memory_space<vmem>>, vector<8x128xf32>,
    return
  }
  func.func @transform_0(%arg0: i32) -> (i32, i32) {
    %c0_i32 = arith.constant 0 : i32
    %c0_i32_0 = arith.constant 0 : i32
    return %arg0, %c0_i32 : i32, i32
  }
  func.func @transform_1(%arg0: i32) -> (i32, i32) {
    %c0_i32 = arith.constant 0 : i32
    %c0_i32_0 = arith.constant 0 : i32
    return %arg0, %c0_i32 : i32, i32
  }
}

</mosaic_0001>

<bundles_post_ra>
// kernel: tpu_custom_call.1
= control target key start
LH: loop header
LB: loop body
LE: loop exit
PB: predicated region body
PF: predicated region fallthrough
CT: control target
= control target key end

     0   :  { %6 = vsyncpa [#allocation3], 0  ;;  %s549_s0 = inlined_call_operand.hbm [shape: f32[40,128], index: 0, kind: input, shape index: {}]   ;;  %s550_s1 = inlined_call_operand.hbm [shape: f32[40,128], index: 1, kind: output, shape index: {}]  }
   0x1   :  { %8 = vsyncpa [#allocation3 + $0x1], 0 }
   0x2   :  { %9 = vsyncpa [#allocation4], 0 }
   0x3   :  { %11 = vsyncpa [#allocation4 + $0x1], 0  ;;  %s390_s6 = smov 0   ;;  %s392_s7 = smov 0  }
   0x4   :  { %s394_s8 = smov 0   ;;  %s396_s9 = smov 0  }
   0x5 LB: > { %s411_s10 = sadd.s32 4294967295, %s376_s9   ;;  %s220_s11 = sadd.s32 4294967294, %s376_s9   ;;  %s376_s9 = sphi %s396_s9, %s564_s9   ;;  %s372_s8 = sphi %s394_s8, %s563_s8   ;;  %s368_s7 = sphi %s392_s7, %s562_s7   ;;  %s364_s6 = sphi %s390_s6, %s561_s6  }
   0x6   : > { %s415_s12 = sadd.s32 1, %s376_s9   ;;  %s24_s13 = sadd.s32 1, %s372_s8 }
   0x7   : > { %s21_s14 = ssub.s32 %s376_s9, %s415_s12  ;;  %p31_p0 = scmp.ne.s32.totalorder %s372_s8, %s368_s7 }
   0x8   : > { %p22_p1 = scmp.eq.s32.totalorder %s21_s14, 0  ;;  %p32_p2 = scmp.eq.s32.totalorder %s376_s9, 0 }
   0x9   : > { %p37_p3 = scmp.ne.s32.totalorder %s368_s7, %s364_s6  ;;  %p38_p4 = scmp.eq.s32.totalorder %s411_s10, 0 }
   0xa   : > { %s427_s15 = scalar_select %p22_p1, %s372_s8, %s24_s13  }
   0xb   : > { %p429_p5 = por %p32_p2, %p31_p0  ;;  %p433_p6 = por %p38_p4, %p37_p3 }
   0xc   : > { %p61_p7 = scmp.eq.s32.totalorder %s411_s10, 4  ;;  %p67_p8 = scmp.eq.s32.totalorder %s220_s11, 4 }
   0xd   : > { %p244_p9 = scmp.lt.s32.totalorder %s376_s9, 5  ;;  %s87_s20 = sand.u32 1, %s372_s8  }
   0xe   : > { %p439_p10 = por %p61_p7, %p31_p0  ;;  %p443_p11 = por %p67_p8, %p37_p3 }
   0xf   : > { %s224_s21 = sshll.u32 %s376_s9, 7  ;;  %s223_s22 = sshll.u32 %s87_s20, 3 }
  0x10   : > { %s554_s18 = scalar_select %p439_p10, 1, 0 }
  0x11   : > { %s555_s19 = scalar_select %p443_p11, 1, 0 }
  0x12   : > { %s452_s25 = scalar_lea.hbm %s549_s0, %s224_s21  ;;  %s91_s26 = scalar_lea.vmem [#allocation2], %s223_s22 }
  0x13   : > { %s98_s27 = sshll.u32 %s91_s26, 4  ;;  %p456_p12 = pnand %p244_p9, %p429_p5  ;;  %s460_s27 = int_to_ptr.vmem [resolvable:$true] %s98_s27 }
  0x14   : > { %s88_s29 = scalar_lea.sflag [#allocation3], %s87_s20  ;;  %s280_s30 = scalar_lea.hbm %s452_s25, 128 }
  0x15   : > { %p281_p1 = scmp.ne.s32.totalorder %s452_s25, %s280_s30  ;;  %p282_p2 = pneg %p456_p12 }
  0x16   : > { %s285_s4 = scalar_lea.hbm %s549_s0, 640  ;;  %p286_p5 = scmp.lt.u32.totalorder %s452_s25, %s549_s0 }
  0x17   : > { %p283_p3 = pnand %p282_p2, %p281_p1  ;;  %p287_p7 = scmp.lt.u32.totalorder %s285_s4, %s280_s30 }
  0x18   : > { %p289_p9 = scmp.lt.u32.totalorder %s280_s30, %s452_s25 }
  0x19   : > { %p284_p4 = pneg %p283_p3  ;;  %p288_p8 = por %p287_p7, %p286_p5 }
  0x1b   : > { %p290_p13 = por %p289_p9, %p288_p8 }
  0x1d   : > { %p291_p0 = pnand %p290_p13, %p284_p4 }
  0x1f   : > { %294 = shalt.err (!%p291_p0)
}
  0x20   : > { %s295_s13 = scalar_lea.vmem %s460_s27, 128  ;;  %s378_s14 = smov [#allocation2]  }
  0x21   : > { %p296_p1 = scmp.ne.s32.totalorder %s460_s27, %s295_s13  ;;  %s300_s16 = sshll.u32 %s378_s14, 4  ;;  %s301_s16 = int_to_ptr.vmem [resolvable:$false] %s300_s16 }
  0x22   : > { %s302_s20 = scalar_lea.vmem %s301_s16, 256  ;;  %p303_p10 = scmp.lt.s32.totalorder %s460_s27, %s301_s16 }
  0x23   : > { %p298_p3 = pnand %p296_p1, %p282_p2  ;;  %p304_p5 = scmp.lt.s32.totalorder %s302_s20, %s295_s13 }
  0x25   : > { %p299_p11 = pneg %p298_p3  ;;  %p305_p7 = por %p304_p5, %p303_p10 }
  0x27   : > { %p306_p8 = pnand %p305_p7, %p299_p11 }
  0x29   : > { %309 = shalt.err (!%p306_p8)
}
  0x2a   : > { %239 = dma.hbm_to_vmem [thread:$0]  (!%p456_p12), %s452_s25, 128, %s460_s27, %s88_s29  }
  0x2b   : > { %p557_p13 = scmp.lt.s32.totalorder %s376_s9, 6  ;;  %p558_p0 = scmp.ge.s32.totalorder %s376_s9, 1 }
  0x2d   : > { %p104_p2 = pnand %p558_p0, %p557_p13 }
  0x2e   : > { %s494_s21 = sand.u32 (!%p104_p2), 1, %s368_s7  }
  0x2f   : > { %107 = sbr.rel (%p104_p2) target bundleno = 83 (0x53), region = 24  ;;  %s226_s22 = sshll.u32 (!%p104_p2), %s494_s21, 3 }
  0x30   : > { %s110_s23 = scalar_lea.sflag (!%p104_p2), [#allocation3], %s494_s21  ;;  %s113_s24 = scalar_lea.vmem (!%p104_p2), [#allocation2], %s226_s22 }
  0x36   : > { %355 = dma.done.wait (%p433_p6), %s110_s23, 128  }
  0x37   : > { %357 = vsyncadd (%p433_p6), %s110_s23, 4294967168  ;;  %v132_v0 = vld [vmem:[%s113_s24] sm:$0xff]  ;;  %s131_s25 = scalar_lea.vmem [#allocation5], %s226_s22  ;;  %s229_s27 = sshll.u32 %s411_s10, 7 }
  0x38   : > { %v133_v1 = vmul.f32 1.442695, %v132_v0  ;;  %s150_s26 = sshll.u32 %s131_s25, 4  ;;  %s508_s30 = scalar_lea.hbm %s550_s1, %s229_s27  ;;  %s503_s26 = int_to_ptr.vmem [resolvable:$true] %s150_s26 }
  0x39   : > { %s137_s17 = scalar_lea.sflag [#allocation4], %s494_s21  ;;  %s310_s2 = scalar_lea.vmem %s503_s26, 128 }
  0x3a   : > { %278 = vpow2.f32 %v133_v1  ;;  %p311_p6 = scmp.ne.s32.totalorder %s503_s26, %s310_s2  ;;  %p559_p10 = scmp.ne.s32.totalorder %s554_s18, 0 }
  0x3b   : > { %s379_s3 = smov [#allocation5]  }
  0x3c   : > { %p312_p11 = pnand %p311_p6, %p559_p10  ;;  %s314_s10 = sshll.u32 %s379_s3, 4  ;;  %s315_s10 = int_to_ptr.vmem [resolvable:$false] %s314_s10 }
  0x3d   : > { %s316_s4 = scalar_lea.vmem %s315_s10, 256  ;;  %p317_p4 = scmp.lt.s32.totalorder %s503_s26, %s315_s10 }
  0x3e   : > { %p313_p12 = pneg %p312_p11  ;;  %p318_p9 = scmp.lt.s32.totalorder %s316_s4, %s310_s2 }
  0x40   : > { %p319_p1 = por %p318_p9, %p317_p4 }
  0x42   : > { %p320_p3 = pnand %p319_p1, %p313_p12 }
  0x44   : > { %v279_v2 = vpop.eup %278 }
  0x45   : > { %135 = vst [vmem:[%s131_s25] sm:$0xff] %v279_v2 }
  0x46   : > { %323 = shalt.err (!%p320_p3)
}
  0x47   : > { %s324_s5 = scalar_lea.hbm %s508_s30, 128  ;;  %s328_s14 = scalar_lea.hbm %s550_s1, 640 }
  0x48   : > { %p325_p5 = scmp.ne.s32.totalorder %s508_s30, %s324_s5  ;;  %p329_p13 = scmp.lt.u32.totalorder %s508_s30, %s550_s1 }
  0x49   : > { %p330_p0 = scmp.lt.u32.totalorder %s328_s14, %s324_s5  ;;  %p332_p6 = scmp.lt.u32.totalorder %s324_s5, %s508_s30 }
  0x4a   : > { %p326_p7 = pnand %p325_p5, %p559_p10 }
  0x4b   : > { %p331_p2 = por %p330_p0, %p329_p13 }
  0x4c   : > { %p327_p8 = pneg %p326_p7 }
  0x4d   : > { %p333_p11 = por %p332_p6, %p331_p2 }
  0x4f   : > { %p334_p12 = pnand %p333_p11, %p327_p8 }
  0x51   : > { %337 = shalt.err (!%p334_p12)
}
  0x52   : > { %234 = dma.vmem_to_hbm [thread:$0]  (%p559_p10), %s503_s26, 128, %s508_s30, %s137_s17  }
  0x53 PF: > { %p245_p4 = scmp.ge.s32.totalorder %s376_s9, 2  ;;  %s162_s21 = sand.u32 1, %s364_s6  }
  0x54   : > { %p560_p9 = scmp.ne.s32.totalorder %s555_s19, 0  ;;  %s163_s22 = scalar_lea.sflag [#allocation4], %s162_s21 }
  0x56   : > { %p241_p1 = pnand %p245_p4, %p560_p9 }
  0x58   : > { %359 = dma.done.wait (!%p241_p1), %s163_s22, 128  }
  0x59   : > { %361 = vsyncadd (!%p241_p1), %s163_s22, 4294967168  ;;  %p14_p3 = scmp.ge.s32.totalorder %s415_s12, 7   ;;  %s561_s6 = smov %s368_s7 }
  0x5a   : > { %s562_s7 = smov %s372_s8  ;;  %s563_s8 = smov %s427_s15 }
  0x5b   : > { %s564_s9 = smov %s415_s12  ;;  %16 = sbr.rel (!%p14_p3) target bundleno = 5 (0x5), region = 69 }
  0x62   :  { %168 = vsyncpa [#allocation3], 1 }
  0x63   :  { %170 = vsyncpa [#allocation3 + $0x1], 1 }
  0x64   :  { %171 = vsyncpa [#allocation4], 1 }
  0x65   :  { %173 = vsyncpa [#allocation4 + $0x1], 1 }

</bundles_post_ra>
